<compile_context>
chip_gen: v7x
topology: tpu7x:2x2x1
jax: 0.10.0
libtpu: 0.0.40
codegen_flags: <defaults>
</compile_context>

<pallas_src>
import functools

import jax
import jax.numpy as jnp
from jax import lax
from jax.experimental import pallas as pl
from jax.experimental.pallas import tpu as pltpu


def _ffn_kernel(x_ref, w1_ref, b1_ref, w2_ref, b2_ref, o_ref):
    # x_ref:  (TM, d_in)       w1_ref: (d_hid, d_in)   b1_ref: (1, d_hid) f32
    # w2_ref: (d_in, d_hid)    b2_ref: (1, d_in)  f32  o_ref:  (TM, d_in)
    x = x_ref[...]

    # h = x @ w1.T  -- contract the shared feature axis directly (PyTorch
    # layout), no transposed copy of the weights anywhere.
    h = lax.dot_general(
        x, w1_ref[...],
        dimension_numbers=(((1,), (1,)), ((), ())),
        preferred_element_type=jnp.float32)
    h = jnp.maximum(h + b1_ref[...], 0.0)

    # y = h @ w2.T
    y = lax.dot_general(
        h.astype(w2_ref.dtype), w2_ref[...],
        dimension_numbers=(((1,), (1,)), ((), ())),
        preferred_element_type=jnp.float32)
    y = y + b2_ref[...]

    o_ref[...] = y.astype(o_ref.dtype)


def _round_up(n, m):
    return ((n + m - 1) // m) * m


def positionwise_feed_forward(x, w1, b1, w2, b2, *,
                              compute_dtype=None, tm=512):
    """Two-layer position-wise FFN.

    x:  (batch, seq, d_in)
    w1: (d_hid, d_in), b1: (d_hid,)   -- nn.Linear(d_in, d_hid) layout
    w2: (d_in, d_hid), b2: (d_in,)    -- nn.Linear(d_hid, d_in) layout
    compute_dtype: optional dtype (e.g. jnp.bfloat16) for the MXU inputs;
                   accumulation stays f32, output matches x.dtype.
    tm: target token-tile size (rows per grid step).  512 is a good default
        for v5e/v6e; use ~256-384 on v7x (64 MiB VMEM) with f32 weights.
    """
    batch, seq, d_in = x.shape
    d_hid = w1.shape[0]
    M = batch * seq

    cd = jnp.dtype(compute_dtype) if compute_dtype is not None else jnp.dtype(x.dtype)
    out_dtype = x.dtype

    # Lane-dense feature dims (multiples of 128); zero padding is inert.
    d_in_p = _round_up(d_in, 128)
    d_hid_p = _round_up(d_hid, 128)

    # Token tile: multiple of the sublane packing for the compute dtype.
    sub = 16 if cd == jnp.dtype(jnp.bfloat16) else 8
    TM = min(_round_up(tm, sub), _round_up(M, sub))
    M_p = _round_up(M, TM)

    x2d = x.reshape(M, d_in).astype(cd)
    if (M_p, d_in_p) != (M, d_in):
        x2d = jnp.pad(x2d, ((0, M_p - M), (0, d_in_p - d_in)))

    w1p = w1.astype(cd)
    w2p = w2.astype(cd)
    if (d_hid_p, d_in_p) != (d_hid, d_in):
        w1p = jnp.pad(w1p, ((0, d_hid_p - d_hid), (0, d_in_p - d_in)))
        w2p = jnp.pad(w2p, ((0, d_in_p - d_in), (0, d_hid_p - d_hid)))

    # Biases stay f32 (added onto the f32 accumulator).
    b1p = jnp.pad(b1.astype(jnp.float32), (0, d_hid_p - d_hid)).reshape(1, d_hid_p)
    b2p = jnp.pad(b2.astype(jnp.float32), (0, d_in_p - d_in)).reshape(1, d_in_p)

    grid = (M_p // TM,)

    itemsize = cd.itemsize
    cost = pl.CostEstimate(
        flops=4 * M_p * d_in_p * d_hid_p,           # two matmuls, 2*M*K*N each
        transcendentals=0,
        bytes_accessed=(M_p * d_in_p * itemsize           # x in
                        + 2 * d_in_p * d_hid_p * itemsize  # w1 + w2
                        + 4 * (d_hid_p + d_in_p)           # biases (f32)
                        + M_p * d_in_p * jnp.dtype(out_dtype).itemsize),  # out
    )

    out2d = pl.pallas_call(
        _ffn_kernel,
        out_shape=jax.ShapeDtypeStruct((M_p, d_in_p), out_dtype),
        grid_spec=pltpu.PrefetchScalarGridSpec(
            num_scalar_prefetch=0,
            grid=grid,
            in_specs=[
                # streaming token tile
                pl.BlockSpec((TM, d_in_p), lambda i: (i, 0)),
                # resident weights / biases (constant block index -> no re-DMA)
                pl.BlockSpec((d_hid_p, d_in_p), lambda i: (0, 0)),
                pl.BlockSpec((1, d_hid_p), lambda i: (0, 0)),
                pl.BlockSpec((d_in_p, d_hid_p), lambda i: (0, 0)),
                pl.BlockSpec((1, d_in_p), lambda i: (0, 0)),
            ],
            out_specs=pl.BlockSpec((TM, d_in_p), lambda i: (i, 0)),
        ),
        compiler_params=pltpu.CompilerParams(
            dimension_semantics=("parallel",),
            vmem_limit_bytes=100 * 1024 * 1024,
        ),
        cost_estimate=cost,
    )(x2d, w1p, b1p, w2p, b2p)

    return out2d[:M, :d_in].reshape(batch, seq, d_in)


def _init_linear(key, out_features, in_features, dtype=jnp.float32):
    """Deterministic init matching nn.Linear default (uniform +-1/sqrt(fan_in))."""
    kw, kb = jax.random.split(key)
    bound = 1.0 / (in_features ** 0.5)
    w = jax.random.uniform(kw, (out_features, in_features), dtype,
                           minval=-bound, maxval=bound)
    b = jax.random.uniform(kb, (out_features,), dtype,
                           minval=-bound, maxval=bound)
    return w, b


if __name__ == "__main__":
    batch, seq, d_in, d_hid = 2, 8, 32, 64

    key = jax.random.PRNGKey(0)
    kx, k1, k2 = jax.random.split(key, 3)

    x = jax.random.normal(kx, (batch, seq, d_in), jnp.float32)
    w1, b1 = _init_linear(k1, d_hid, d_in)   # nn.Linear(d_in, d_hid)
    w2, b2 = _init_linear(k2, d_in, d_hid)   # nn.Linear(d_hid, d_in)

    # Reference (same semantics as the PyTorch module), f32.
    ref = jnp.maximum(x @ w1.T + b1, 0.0) @ w2.T + b2

    # f32 compute path: tight tolerance.
    y = positionwise_feed_forward(x, w1, b1, w2, b2)
    y = jax.block_until_ready(y)
    assert y.shape == (batch, seq, d_in)
    assert jnp.allclose(y, ref, atol=1e-5, rtol=1e-5), "f32 path mismatch"

    # bf16 MXU-input path (f32 accumulation): looser tolerance, as expected
    # for bf16-rounded activations/weights.
    y_bf16 = positionwise_feed_forward(x, w1, b1, w2, b2,
                                       compute_dtype=jnp.bfloat16)
    y_bf16 = jax.block_until_ready(y_bf16)
    assert jnp.allclose(y_bf16, ref, atol=1e-1, rtol=5e-2), "bf16 path mismatch"

    print("KERNEL_OK")
</pallas_src>

<mosaic_0001>
module attributes {stable_mosaic.version = 11 : i64} {
  func.func @_ffn_kernel(%arg0: i32, %arg1: memref<16x128xf32, #tpu.memory_space<vmem>>, %arg2: memref<128x128xf32, #tpu.memory_space<vmem>>, %arg3: memref<1x128xf32, #tpu.memory_space<vmem>>, %arg4: memref<128x128xf32, #tpu.memory_space<vmem>>, %arg5: memref<1x128xf32, #tpu.memory_space<vmem>>, %arg6: memref<16x128xf32, #tpu.memory_space<vmem>>) attributes {dimension_semantics = [#tpu.dimension_semantics<parallel>], iteration_bounds = array<i64: 1>, scalar_prefetch = 0 : i64, scratch_operands = 0 : i64, tpu.core_type = #tpu.core_type<tc>, window_params = [{transform_indices = @transform_0, window_bounds = array<i64: 16, 128>}, {pipeline_mode = #tpu.pipeline_mode<synchronous>, transform_indices = @transform_1, window_bounds = array<i64: 128, 128>}, {pipeline_mode = #tpu.pipeline_mode<synchronous>, transform_indices = @transform_2, window_bounds = array<i64: 1, 128>}, {pipeline_mode = #tpu.pipeline_mode<synchronous>, transform_indices = @transform_3, window_bounds = array<i64: 128, 128>}, {pipeline_mode = #tpu.pipeline_mode<synchronous>, transform_indices = @transform_4, window_bounds = array<i64: 1, 128>}, {transform_indices = @transform_5, window_bounds = array<i64: 16, 128>}]} {
    %c0 = arith.constant 0 : index
    %c0_0 = arith.constant 0 : index
    %0 = vector.load %arg1[%c0, %c0_0] : memref<16x128xf32, #tpu.memory_space<vmem>>, vector<16x128xf32>
    %c0_1 = arith.constant 0 : index
    %c0_2 = arith.constant 0 : index
    %1 = vector.load %arg2[%c0_1, %c0_2] : memref<128x128xf32, #tpu.memory_space<vmem>>, vector<128x128xf32>
    %cst = arith.constant dense<0.000000e+00> : vector<16x128xf32>
    %2 = tpu.matmul %0, %1, %cst {dimension_numbers = #tpu.dot_dimension_numbers<[1], [1], [0], [0], [0, 0, 1, 0], [], []>} : vector<16x128xf32>, vector<128x128xf32>, vector<16x128xf32> -> vector<16x128xf32>
    %c0_3 = arith.constant 0 : index
    %c0_4 = arith.constant 0 : index
    %3 = vector.load %arg3[%c0_3, %c0_4] : memref<1x128xf32, #tpu.memory_space<vmem>>, vector<1x128xf32>
    %4 = vector.broadcast %3 : vector<1x128xf32> to vector<16x128xf32>
    %5 = arith.addf %2, %4 : vector<16x128xf32>
    %cst_5 = arith.constant 0.000000e+00 : f32
    %6 = vector.broadcast %cst_5 : f32 to vector<16x128xf32>
    %7 = arith.maximumf %5, %6 : vector<16x128xf32>
    %c0_6 = arith.constant 0 : index
    %c0_7 = arith.constant 0 : index
    %8 = vector.load %arg4[%c0_6, %c0_7] : memref<128x128xf32, #tpu.memory_space<vmem>>, vector<128x128xf32>
    %cst_8 = arith.constant dense<0.000000e+00> : vector<16x128xf32>
    %9 = tpu.matmul %7, %8, %cst_8 {dimension_numbers = #tpu.dot_dimension_numbers<[1], [1], [0], [0], [0, 0, 1, 0], [], []>} : vector<16x128xf32>, vector<128x128xf32>, vector<16x128xf32> -> vector<16x128xf32>
    %c0_9 = arith.constant 0 : index
    %c0_10 = arith.constant 0 : index
    %10 = vector.load %arg5[%c0_9, %c0_10] : memref<1x128xf32, #tpu.memory_space<vmem>>, vector<1x128xf32>
    %11 = vector.broadcast %10 : vector<1x128xf32> to vector<16x128xf32>
    %12 = arith.addf %9, %11 : vector<16x128xf32>
    %c0_11 = arith.constant 0 : index
    %c0_12 = arith.constant 0 : index
    %13 = vector.load %arg6[%c0_11, %c0_12] : memref<16x128xf32, #tpu.memory_space<vmem>>, vector<16x128xf32>
    tpu.vector_store %arg6[%c0_11, %c0_12], %12 {strides = array<i32>} : memref<16x128xf32, #tpu.memory_space<vmem>>, vector<16x128xf32>,
    return
  }
  func.func @transform_0(%arg0: i32) -> (i32, i32) {
    %c0_i32 = arith.constant 0 : i32
    %c0_i32_0 = arith.constant 0 : i32
    return %arg0, %c0_i32 : i32, i32
  }
  func.func @transform_1(%arg0: i32) -> (i32, i32) {
    %c0_i32 = arith.constant 0 : i32
    %c0_i32_0 = arith.constant 0 : i32
    %c0_i32_1 = arith.constant 0 : i32
    return %c0_i32, %c0_i32_0 : i32, i32
  }
  func.func @transform_2(%arg0: i32) -> (i32, i32) {
    %c0_i32 = arith.constant 0 : i32
    %c0_i32_0 = arith.constant 0 : i32
    %c0_i32_1 = arith.constant 0 : i32
    return %c0_i32, %c0_i32_0 : i32, i32
  }
  func.func @transform_3(%arg0: i32) -> (i32, i32) {
    %c0_i32 = arith.constant 0 : i32
    %c0_i32_0 = arith.constant 0 : i32
    %c0_i32_1 = arith.constant 0 : i32
    return %c0_i32, %c0_i32_0 : i32, i32
  }
  func.func @transform_4(%arg0: i32) -> (i32, i32) {
    %c0_i32 = arith.constant 0 : i32
    %c0_i32_0 = arith.constant 0 : i32
    %c0_i32_1 = arith.constant 0 : i32
    return %c0_i32, %c0_i32_0 : i32, i32
  }
  func.func @transform_5(%arg0: i32) -> (i32, i32) {
    %c0_i32 = arith.constant 0 : i32
    %c0_i32_0 = arith.constant 0 : i32
    return %arg0, %c0_i32 : i32, i32
  }
}

</mosaic_0001>

<bundles_post_ra>
// kernel: tpu_custom_call.1
= control target key start
LH: loop header
LB: loop body
LE: loop exit
PB: predicated region body
PF: predicated region fallthrough
CT: control target
= control target key end

     0   :  { %10 = vsyncpa [#allocation3], 0  ;;  %s755_s0 = inlined_call_operand.hbm [shape: f32[16,128], index: 0, kind: input, shape index: {}]   ;;  %s756_s1 = inlined_call_operand.hbm [shape: f32[128,128], index: 1, kind: input, shape index: {}]   ;;  %s757_s2 = inlined_call_operand.hbm [shape: f32[1,128], index: 2, kind: input, shape index: {}]   ;;  %s758_s3 = inlined_call_operand.hbm [shape: f32[128,128], index: 3, kind: input, shape index: {}]   ;;  %s759_s4 = inlined_call_operand.hbm [shape: f32[1,128], index: 4, kind: input, shape index: {}]   ;;  %s760_s5 = inlined_call_operand.hbm [shape: f32[16,128], index: 5, kind: output, shape index: {}]  }
   0x1   :  { %11 = vsyncpa [#allocation6], 0 }
   0x2   :  { %12 = vsyncpa [#allocation9], 0 }
   0x3   :  { %13 = vsyncpa [#allocation4], 0  ;;  %s626_s18 = smov [#allocation5]   ;;  %s627_s20 = smov [#allocation8]  }
   0x4   :  { %s31_s19 = sshll.u32 %s626_s18, 4  ;;  %s53_s21 = sshll.u32 %s627_s20, 4  ;;  %s32_s19 = int_to_ptr.vmem [resolvable:$true] %s31_s19  ;;  %s664_s21 = int_to_ptr.vmem [resolvable:$true] %s53_s21 }
   0x5   :  { %s486_s24 = scalar_lea.hbm %s756_s1, 2048 }
   0x6   :  { %p487_p0 = scmp.ne.s32.totalorder %s756_s1, %s486_s24  ;;  %p490_p1 = scmp.lt.u32.totalorder %s486_s24, %s756_s1 }
   0x8   :  { %p492_p2 = pnand %p490_p1, %p487_p0 }
   0xa   :  { %495 = shalt.err (!%p492_p2)
}
   0xb   :  { %s496_s29 = scalar_lea.vmem %s32_s19, 2048  ;;  %p501_p4 = scmp.lt.s32.totalorder %s32_s19, %s32_s19 }
   0xc   :  { %p497_p3 = scmp.ne.s32.totalorder %s32_s19, %s496_s29  ;;  %p502_p5 = scmp.lt.s32.totalorder %s496_s29, %s496_s29 }
   0xe   :  { %p503_p6 = por %p502_p5, %p501_p4 }
  0x10   :  { %p504_p7 = pnand %p503_p6, %p497_p3 }
  0x12   :  { %507 = shalt.err (!%p504_p7)
}
  0x13   :  { %s628_s30 = smov 128   ;;  %s629_s6 = smov 8  }
  0x14   :  { %37 = dma.hbm_to_vmem [thread:$0]  %s756_s1, 2048, %s32_s19, [#allocation6], %s628_s30, %s628_s30, %s629_s6  }
  0x15   :  { %s508_s11 = scalar_lea.hbm %s758_s3, 2048 }
  0x16   :  { %p509_p8 = scmp.ne.s32.totalorder %s758_s3, %s508_s11  ;;  %p512_p9 = scmp.lt.u32.totalorder %s508_s11, %s758_s3 }
  0x18   :  { %p514_p10 = pnand %p512_p9, %p509_p8 }
  0x1a   :  { %517 = shalt.err (!%p514_p10)
}
  0x1b   :  { %s518_s16 = scalar_lea.vmem %s664_s21, 2048  ;;  %p523_p12 = scmp.lt.s32.totalorder %s664_s21, %s664_s21 }
  0x1c   :  { %p519_p11 = scmp.ne.s32.totalorder %s664_s21, %s518_s16  ;;  %p524_p13 = scmp.lt.s32.totalorder %s518_s16, %s518_s16 }
  0x1e   :  { %p525_p0 = por %p524_p13, %p523_p12 }
  0x20   :  { %p526_p1 = pnand %p525_p0, %p519_p11 }
  0x22   :  { %529 = shalt.err (!%p526_p1)
}
  0x23   :  { %59 = dma.hbm_to_vmem [thread:$0]  %s758_s3, 2048, %s664_s21, [#allocation9], %s628_s30, %s628_s30, %s629_s6  }
  0x24   :  { %s630_s18 = smov [#allocation2]   ;;  %s631_s20 = smov [#allocation7]  }
  0x25   :  { %s19_s19 = sshll.u32 %s630_s18, 4  ;;  %s44_s22 = sshll.u32 %s631_s20, 4  ;;  %s20_s19 = int_to_ptr.vmem [resolvable:$true] %s19_s19  ;;  %s45_s22 = int_to_ptr.vmem [resolvable:$true] %s44_s22 }
  0x26   :  { %s530_s25 = scalar_lea.hbm %s755_s0, 256 }
  0x27   :  { %p531_p2 = scmp.ne.s32.totalorder %s755_s0, %s530_s25  ;;  %p534_p3 = scmp.lt.u32.totalorder %s530_s25, %s755_s0 }
  0x29   :  { %p536_p4 = pnand %p534_p3, %p531_p2 }
  0x2b   :  { %539 = shalt.err (!%p536_p4)
}
  0x2c   :  { %s540_s3 = scalar_lea.vmem %s20_s19, 256  ;;  %p545_p6 = scmp.lt.s32.totalorder %s20_s19, %s20_s19 }
  0x2d   :  { %p541_p5 = scmp.ne.s32.totalorder %s20_s19, %s540_s3  ;;  %p546_p7 = scmp.lt.s32.totalorder %s540_s3, %s540_s3 }
  0x2f   :  { %p547_p8 = por %p546_p7, %p545_p6 }
  0x31   :  { %p548_p9 = pnand %p547_p8, %p541_p5 }
  0x33   :  { %551 = shalt.err (!%p548_p9)
}
  0x34   :  { %25 = dma.hbm_to_vmem [thread:$0]  %s755_s0, 256, %s20_s19, [#allocation3], %s628_s30, %s628_s30, %s629_s6  }
  0x35   :  { %s552_s10 = scalar_lea.hbm %s757_s2, 16 }
  0x36   :  { %p553_p10 = scmp.ne.s32.totalorder %s757_s2, %s552_s10  ;;  %p556_p11 = scmp.lt.u32.totalorder %s552_s10, %s757_s2 }
  0x38   :  { %p558_p12 = pnand %p556_p11, %p553_p10 }
  0x3a   :  { %561 = shalt.err (!%p558_p12)
}
  0x3b   :  { %s562_s15 = scalar_lea.vmem %s45_s22, 16  ;;  %s566_s16 = scalar_lea.vmem %s45_s22, 32 }
  0x3c   :  { %p563_p13 = scmp.ne.s32.totalorder %s45_s22, %s562_s15  ;;  %p567_p0 = scmp.lt.s32.totalorder %s45_s22, %s45_s22 }
  0x3d   :  { %p568_p1 = scmp.lt.s32.totalorder %s566_s16, %s562_s15 }
  0x3f   :  { %p569_p2 = por %p568_p1, %p567_p0 }
  0x41   :  { %p570_p3 = pnand %p569_p2, %p563_p13 }
  0x43   :  { %573 = shalt.err (!%p570_p3)
}
  0x44   :  { %47 = dma.hbm_to_vmem [thread:$0]  %s757_s2, 16, %s45_s22, [#allocation6]  }
  0x45   :  { %s632_s17 = smov [#allocation10]   ;;  %s574_s23 = scalar_lea.hbm %s759_s4, 16 }
  0x46   :  { %s66_s18 = sshll.u32 %s632_s17, 4  ;;  %p575_p4 = scmp.ne.s32.totalorder %s759_s4, %s574_s23  ;;  %s67_s18 = int_to_ptr.vmem [resolvable:$true] %s66_s18 }
  0x47   :  { %p578_p5 = scmp.lt.u32.totalorder %s574_s23, %s759_s4 }
  0x49   :  { %p580_p6 = pnand %p578_p5, %p575_p4 }
  0x4b   :  { %583 = shalt.err (!%p580_p6)
}
  0x4c   :  { %s584_s28 = scalar_lea.vmem %s67_s18, 16  ;;  %s588_s2 = scalar_lea.vmem %s67_s18, 32 }
  0x4d   :  { %p585_p7 = scmp.ne.s32.totalorder %s67_s18, %s584_s28  ;;  %p589_p8 = scmp.lt.s32.totalorder %s67_s18, %s67_s18 }
  0x4e   :  { %p590_p9 = scmp.lt.s32.totalorder %s588_s2, %s584_s28 }
  0x50   :  { %p591_p10 = por %p590_p9, %p589_p8 }
  0x52   :  { %p592_p11 = pnand %p591_p10, %p585_p7 }
  0x54   :  { %595 = shalt.err (!%p592_p11)
}
  0x55   :  { %69 = dma.hbm_to_vmem [thread:$0]  %s759_s4, 16, %s67_s18, [#allocation9]  }
  0x56   :  { %618 = dma.done.wait [#allocation3], 256  }
  0x57   :  { %619 = vsyncadd [#allocation3], 4294967040 }
  0x58   :  { %620 = dma.done.wait [#allocation6], 2064  }
  0x59   :  { %621 = vsyncadd [#allocation6], 4294965232 }
  0x5a   :  { %622 = dma.done.wait [#allocation9], 2064  }
  0x5b   :  { %623 = vsyncadd [#allocation9], 4294965232  ;;  %v87_v0 = vld [vmem:[#allocation5] sm:$0xff]  ;;  %v88_v1 = vld [vmem:[#allocation5 + $0x8] sm:$0xff]  ;;  %s633_s4 = smov [#allocation11]  }
  0x5c   :  { %v89_v2 = vld [vmem:[#allocation5 + $0x10] sm:$0xff]  ;;  %v414_v3 = vpack.c.bf16 %v88_v1, %v87_v0  ;;  %v90_v4 = vld [vmem:[#allocation5 + $0x18] sm:$0xff]  ;;  %v91_v6 = vld [vmem:[#allocation5 + $0x20] sm:$0xff]  ;;  %s292_s3 = sshll.u32 %s633_s4, 4  ;;  %s293_s3 = int_to_ptr.vmem [resolvable:$true] %s292_s3 }
  0x5d   :  { %v418_v5 = vpack.c.bf16 %v90_v4, %v89_v2  ;;  %v92_v7 = vld [vmem:[#allocation5 + $0x28] sm:$0xff]  ;;  %v85_v8 = vld [vmem:[#allocation2] sm:$0xff]  ;;  %v190_v13 = vld [vmem:[#allocation8 + $0x18] sm:$0xff]  ;;  %s596_s21 = scalar_lea.vmem %s293_s3, 256  ;;  %p601_p13 = scmp.lt.s32.totalorder %s293_s3, %s293_s3 }
  0x5e   :  { %415 = vmatprep.subr.bf16.mxu0 %v414_v3  ;;  %376 = vmatprep.mubr.f32.mxu0 %v85_v8  ;;  %v187_v9 = vld [vmem:[#allocation8] sm:$0xff]  ;;  %v188_v10 = vld [vmem:[#allocation8 + $0x8] sm:$0xff]  ;;  %v189_v11 = vld [vmem:[#allocation8 + $0x10] sm:$0xff]  ;;  %v422_v15 = vpack.c.bf16 %v92_v7, %v91_v6  ;;  %p597_p12 = scmp.ne.s32.totalorder %s293_s3, %s596_s21  ;;  %p602_p0 = scmp.lt.s32.totalorder %s596_s21, %s596_s21 }
  0x5f   :  { %417 = vmatpush3.bf16.xpose.msra.mxu0 %v414_v3  ;;  %v446_v12 = vpack.c.bf16 %v188_v10, %v187_v9  ;;  %v450_v14 = vpack.c.bf16 %v190_v13, %v189_v11  ;;  %v191_v16 = vld [vmem:[#allocation8 + $0x20] sm:$0xff]  ;;  %v192_v17 = vld [vmem:[#allocation8 + $0x28] sm:$0xff]  ;;  %v94_v19 = vld [vmem:[#allocation5 + $0x38] sm:$0xff] }
  0x60   :  { %419 = vmatprep.subr.bf16.mxu0 %v418_v5  ;;  %v93_v18 = vld [vmem:[#allocation5 + $0x30] sm:$0xff]  ;;  %v454_v20 = vpack.c.bf16 %v192_v17, %v191_v16  ;;  %v194_v23 = vld [vmem:[#allocation8 + $0x38] sm:$0xff]  ;;  %v96_v25 = vld [vmem:[#allocation5 + $0x48] sm:$0xff]  ;;  %p603_p1 = por %p602_p0, %p601_p13 }
  0x61   :  { %447 = vmatprep.subr.bf16.mxu1 %v446_v12  ;;  %v426_v21 = vpack.c.bf16 %v94_v19, %v93_v18  ;;  %v193_v22 = vld [vmem:[#allocation8 + $0x30] sm:$0xff]  ;;  %v95_v24 = vld [vmem:[#allocation5 + $0x40] sm:$0xff]  ;;  %v196_v29 = vld [vmem:[#allocation8 + $0x48] sm:$0xff] }
  0x62   :  { %449 = vmatpush3.bf16.xpose.msra.mxu1 %v446_v12  ;;  %v458_v26 = vpack.c.bf16 %v194_v23, %v193_v22  ;;  %v430_v27 = vpack.c.bf16 %v96_v25, %v95_v24  ;;  %v195_v28 = vld [vmem:[#allocation8 + $0x40] sm:$0xff]  ;;  %v97_v30 = vld [vmem:[#allocation5 + $0x50] sm:$0xff]  ;;  %v98_v31 = vld [vmem:[#allocation5 + $0x58] sm:$0xff]  ;;  %p604_p2 = pnand %p603_p1, %p597_p12 }
  0x63   :  { %451 = vmatprep.subr.bf16.mxu1 %v450_v14  ;;  %v462_v32 = vpack.c.bf16 %v196_v29, %v195_v28  ;;  %v434_v33 = vpack.c.bf16 %v98_v31, %v97_v30  ;;  %v197_v34 = vld [vmem:[#allocation8 + $0x50] sm:$0xff]  ;;  %v198_v35 = vld [vmem:[#allocation8 + $0x58] sm:$0xff]  ;;  %v100_v37 = vld [vmem:[#allocation5 + $0x68] sm:$0xff] }
  0x64   :  { %v99_v36 = vld [vmem:[#allocation5 + $0x60] sm:$0xff]  ;;  %v466_v38 = vpack.c.bf16 %v198_v35, %v197_v34  ;;  %v200_v41 = vld [vmem:[#allocation8 + $0x68] sm:$0xff]  ;;  %v102_v43 = vld [vmem:[#allocation5 + $0x78] sm:$0xff] }
  0x65   :  { %v438_v39 = vpack.c.bf16 %v100_v37, %v99_v36  ;;  %v199_v40 = vld [vmem:[#allocation8 + $0x60] sm:$0xff]  ;;  %v101_v42 = vld [vmem:[#allocation5 + $0x70] sm:$0xff]  ;;  %v202_v47 = vld [vmem:[#allocation8 + $0x78] sm:$0xff] }
  0x66   :  { %v470_v44 = vpack.c.bf16 %v200_v41, %v199_v40  ;;  %v442_v45 = vpack.c.bf16 %v102_v43, %v101_v42  ;;  %v201_v46 = vld [vmem:[#allocation8 + $0x70] sm:$0xff]  ;;  %v306_v50 = vld [vmem:[#allocation7] ss:$0 sm:$0xff]  ;;  %v307_v57 = vld [vmem:[#allocation10] ss:$0 sm:$0xff] }
  0x67   :  { %421 = vmatpush3.bf16.xpose.msra.mxu0 %v418_v5  ;;  %v474_v48 = vpack.c.bf16 %v202_v47, %v201_v46  ;;  %v86_v49 = vld [vmem:[#allocation2 + $0x8] sm:$0xff] }
  0x68   :  { %423 = vmatprep.subr.bf16.mxu0 %v422_v15 }
  0x6a   :  { %453 = vmatpush3.bf16.xpose.msra.mxu1 %v450_v14 }
  0x6b   :  { %455 = vmatprep.subr.bf16.mxu1 %v454_v20 }
  0x6f   :  { %425 = vmatpush3.bf16.xpose.msra.mxu0 %v422_v15 }
  0x70   :  { %427 = vmatprep.subr.bf16.mxu0 %v426_v21 }
  0x72   :  { %457 = vmatpush3.bf16.xpose.msra.mxu1 %v454_v20 }
  0x73   :  { %459 = vmatprep.subr.bf16.mxu1 %v458_v26 }
  0x77   :  { %429 = vmatpush3.bf16.xpose.msra.mxu0 %v426_v21 }
  0x78   :  { %431 = vmatprep.subr.bf16.mxu0 %v430_v27 }
  0x7a   :  { %461 = vmatpush3.bf16.xpose.msra.mxu1 %v458_v26 }
  0x7b   :  { %463 = vmatprep.subr.bf16.mxu1 %v462_v32 }
  0x7f   :  { %433 = vmatpush3.bf16.xpose.msra.mxu0 %v430_v27 }
  0x80   :  { %435 = vmatprep.subr.bf16.mxu0 %v434_v33 }
  0x82   :  { %465 = vmatpush3.bf16.xpose.msra.mxu1 %v462_v32 }
  0x83   :  { %467 = vmatprep.subr.bf16.mxu1 %v466_v38 }
  0x87   :  { %437 = vmatpush3.bf16.xpose.msra.mxu0 %v434_v33 }
  0x88   :  { %439 = vmatprep.subr.bf16.mxu0 %v438_v39 }
  0x8a   :  { %469 = vmatpush3.bf16.xpose.msra.mxu1 %v466_v38 }
  0x8b   :  { %471 = vmatprep.subr.bf16.mxu1 %v470_v44 }
  0x8f   :  { %441 = vmatpush3.bf16.xpose.msra.mxu0 %v438_v39 }
  0x90   :  { %443 = vmatprep.subr.bf16.mxu0 %v442_v45 }
  0x92   :  { %473 = vmatpush3.bf16.xpose.msra.mxu1 %v470_v44 }
  0x93   :  { %475 = vmatprep.subr.bf16.mxu1 %v474_v48 }
  0x97   :  { %445 = vmatpush3.bf16.xpose.msra.mxu0 %v442_v45 }
  0x9a   :  { %477 = vmatpush3.bf16.xpose.msra.mxu1 %v474_v48 }
  0x9e   :  { %377 = vmatmul.mubr.f32.vlgmr.msra.gmra.mrb[0].mxu0 %v86_v49 }
 0x171   :  { %v378_v51 = vpop.f32.mrb[0].mxu0 }
 0x172   :  { %v182_v52 = vadd.f32 %v378_v51, %v306_v50  ;;  %v176_v53 = vpop.f32.mrb[1].mxu0 }
 0x173   :  { %v177_v54 = vadd.f32 %v306_v50, %v176_v53 }
 0x174   :  { %v186_v56 = vmax.f32 %v182_v52, 0.0 }
 0x175   :  { %v185_v55 = vmax.f32 %v177_v54, 0.0 }
 0x177   :  { %411 = vmatprep.mubr.f32.mxu1 %v185_v55 }
 0x178   :  { %412 = vmatmul.mubr.f32.vlgmr.msra.gmra.mrb[0].mxu1 %v186_v56 }
 0x24b   :  { %v413_v58 = vpop.f32.mrb[0].mxu1 }
 0x24c   :  { %v282_v59 = vadd.f32 %v413_v58, %v307_v57  ;;  %v276_v60 = vpop.f32.mrb[1].mxu1 }
 0x24d   :  { %v277_v61 = vadd.f32 %v307_v57, %v276_v60 }
 0x24e   :  { %286 = vst [vmem:[#allocation11 + $0x8] sm:$0xff] %v282_v59 }
 0x24f   :  { %285 = vst [vmem:[#allocation11] sm:$0xff] %v277_v61 }
 0x250   :  { %607 = shalt.err (!%p604_p2)
}
 0x251   :  { %s608_s9 = scalar_lea.hbm %s760_s5, 256 }
 0x252   :  { %p609_p3 = scmp.ne.s32.totalorder %s760_s5, %s608_s9  ;;  %p612_p4 = scmp.lt.u32.totalorder %s608_s9, %s760_s5 }
 0x254   :  { %p614_p5 = pnand %p612_p4, %p609_p3 }
 0x256   :  { %617 = shalt.err (!%p614_p5)
}
 0x257   :  { %298 = dma.vmem_to_hbm [thread:$0]  %s293_s3, 256, %s760_s5, [#allocation4], %s628_s30, %s628_s30, %s629_s6  }
 0x258   :  { %624 = dma.done.wait [#allocation4], 256  }
 0x259   :  { %625 = vsyncadd [#allocation4], 4294967040 }
 0x25a   :  { %302 = vsyncpa [#allocation3], 1 }
 0x25b   :  { %303 = vsyncpa [#allocation6], 1 }
 0x25c   :  { %304 = vsyncpa [#allocation9], 1 }
 0x25d   :  { %305 = vsyncpa [#allocation4], 1 }

</bundles_post_ra>
